<compile_context>
chip_gen: v7x
topology: tpu7x:2x2x1
jax: 0.10.0
libtpu: 0.0.40
codegen_flags: <defaults>
</compile_context>

<pallas_src>
import functools

import jax
import jax.numpy as jnp
from jax.experimental import pallas as pl
from jax.experimental.pallas import tpu as pltpu

LEAKY_SLOPE = 0.1
BN_EPS = 1e-5

architecture_config = [
    (7, 64, 2, 3), 'M', (3, 192, 1, 1), 'M', (1, 128, 1, 0), (3, 256, 1, 1),
    (1, 256, 1, 0), (3, 512, 1, 1), 'M', [(1, 256, 1, 0), (3, 512, 1, 1), 4],
    (1, 512, 1, 0), (3, 1024, 1, 1), 'M', [(1, 512, 1, 0), (3, 1024, 1, 1), 2],
    (3, 1024, 1, 1), (3, 1024, 2, 1), (3, 1024, 1, 1), (3, 1024, 1, 1),
]


def _round_up(x, m):
    return ((x + m - 1) // m) * m


def _largest_tile(padded, quantum, cap):
    """Largest multiple of `quantum` that divides `padded` and is <= cap."""
    best = quantum
    t = quantum
    while t <= min(cap, padded):
        if padded % t == 0:
            best = t
        t += quantum
    return best


# ---------------------------------------------------------------------------
# Pallas kernels
# ---------------------------------------------------------------------------
def _fused_matmul_kernel(x_ref, w_ref, b_ref, o_ref, acc_ref, *, leaky):
    """acc += x @ w (bf16 operands, f32 acc); last K step: out = act(acc + shift)."""
    @pl.when(pl.program_id(2) == 0)
    def _init():
        acc_ref[...] = jnp.zeros_like(acc_ref)

    acc_ref[...] += jnp.dot(x_ref[...], w_ref[...],
                            preferred_element_type=jnp.float32)

    @pl.when(pl.program_id(2) == pl.num_programs(2) - 1)
    def _finalize():
        y = acc_ref[...] + b_ref[...]
        if leaky:
            y = jnp.where(y > 0, y, LEAKY_SLOPE * y)
        o_ref[...] = y.astype(o_ref.dtype)


def _maxpool_kernel(x_ref, o_ref, *, wo, c):
    """2x2/stride-2 max-pool.  Input block is (rb, 2*Wo, 2*C) laid out so the
    sublane axis is (hi, wo) and the lane axis is (wi, cin); the pool reduces to
    two elementwise maxima over contiguous halves (no strided slices)."""
    v = x_ref[...]                                        # (rb, 2*Wo, 2*C)
    u = jnp.maximum(v[:, :wo, :], v[:, wo:, :])           # max over hi
    o_ref[...] = jnp.maximum(u[:, :, :c], u[:, :, c:])    # max over wi -> (rb,Wo,C)


# ---------------------------------------------------------------------------
# Fused matmul wrapper (conv-as-GEMM and FC layers)
# ---------------------------------------------------------------------------
def fused_matmul(x, prep, *, leaky, out_dtype):
    """y = act(x @ Wp + shift) using pre-padded bf16 weights from `prep`."""
    M, K = x.shape
    Kp, Np, tk, tn, N = prep["Kp"], prep["Np"], prep["tk"], prep["tn"], prep["N"]
    assert K == prep["K"]

    tm = min(512, _round_up(M, 16))        # bf16 packs 16 sublanes / vreg
    Mp = _round_up(M, tm)

    xb = x.astype(jnp.bfloat16)
    if (Mp, Kp) != (M, K):                 # only pad when the shape demands it
        xb = jnp.pad(xb, ((0, Mp - M), (0, Kp - K)))

    kernel = functools.partial(_fused_matmul_kernel, leaky=leaky)
    out = pl.pallas_call(
        kernel,
        out_shape=jax.ShapeDtypeStruct((Mp, Np), out_dtype),
        grid_spec=pltpu.PrefetchScalarGridSpec(
            num_scalar_prefetch=0,
            grid=(Mp // tm, Np // tn, Kp // tk),
            in_specs=[
                pl.BlockSpec((tm, tk), lambda i, j, k: (i, k)),
                pl.BlockSpec((tk, tn), lambda i, j, k: (k, j)),
                pl.BlockSpec((1, tn), lambda i, j, k: (0, j)),
            ],
            out_specs=pl.BlockSpec((tm, tn), lambda i, j, k: (i, j)),
            scratch_shapes=[pltpu.VMEM((tm, tn), jnp.float32)],
        ),
        compiler_params=pltpu.CompilerParams(
            dimension_semantics=("parallel", "parallel", "arbitrary")),
    )(xb, prep["wp"], prep["bp"])

    if (Mp, Np) != (M, N):
        out = out[:M, :N]
    return out


# ---------------------------------------------------------------------------
# MaxPool2d(kernel_size=2, stride=2) — tiled Pallas kernel, no slice copies.
# ---------------------------------------------------------------------------
def maxpool2x2(x):
    N, H, W, C = x.shape
    Ho, Wo = H // 2, W // 2
    M2 = N * Ho
    # (N, H, W, C) -> (N*Ho, 2*Wo, 2*C) is a pure (free) reshape: rows=(n,ho),
    # sublanes=(hi,wo), lanes=(wi,c).
    xr = x.reshape(M2, 2 * Wo, 2 * C)

    # Pick a row-block that divides M2 and keeps the VMEM block comfortably small
    # (row bytes estimated with sublane/lane padding included).
    row_bytes = _round_up(2 * Wo, 16) * _round_up(2 * C, 128) * x.dtype.itemsize
    cap = max(1, min(256, (4 << 20) // max(1, row_bytes)))
    rb = 1
    for d in range(1, min(cap, M2) + 1):
        if M2 % d == 0:
            rb = d

    kernel = functools.partial(_maxpool_kernel, wo=Wo, c=C)
    out = pl.pallas_call(
        kernel,
        out_shape=jax.ShapeDtypeStruct((M2, Wo, C), x.dtype),
        grid_spec=pltpu.PrefetchScalarGridSpec(
            num_scalar_prefetch=0,
            grid=(M2 // rb,),
            in_specs=[pl.BlockSpec((rb, 2 * Wo, 2 * C), lambda i: (i, 0, 0))],
            out_specs=pl.BlockSpec((rb, Wo, C), lambda i: (i, 0, 0)),
        ),
        compiler_params=pltpu.CompilerParams(dimension_semantics=("parallel",)),
    )(xr)
    return out.reshape(N, Ho, Wo, C)


# ---------------------------------------------------------------------------
# Glue: im2col + CNN block
# ---------------------------------------------------------------------------
def im2col(x, kh, kw, stride, padding):
    N, H, W, C = x.shape
    xp = jnp.pad(x, ((0, 0), (padding, padding), (padding, padding), (0, 0)))
    Ho = (H + 2 * padding - kh) // stride + 1
    Wo = (W + 2 * padding - kw) // stride + 1
    cols = []
    for dy in range(kh):
        for dx in range(kw):
            cols.append(
                xp[:, dy:dy + stride * Ho:stride, dx:dx + stride * Wo:stride, :])
    patches = jnp.concatenate(cols, axis=-1)          # (N, Ho, Wo, kh*kw*C)
    return patches.reshape(N * Ho * Wo, kh * kw * C), Ho, Wo


def cnn_block(x, cp):
    """Conv2d(bias=False) + BatchNorm2d (inference, folded) + LeakyReLU(0.1)."""
    cols, Ho, Wo = im2col(x, cp["kh"], cp["kw"], cp["stride"], cp["padding"])
    y = fused_matmul(cols, cp, leaky=True, out_dtype=jnp.bfloat16)
    return y.reshape(x.shape[0], Ho, Wo, cp["N"])


# ---------------------------------------------------------------------------
# Parameter construction / one-time preparation (hoisted out of the forward)
# ---------------------------------------------------------------------------
def _prep_conv(key, cin, cout, k, stride, padding):
    k1, k2, k3, k4, k5 = jax.random.split(key, 5)
    fan_in = cin * k * k
    w = jax.random.normal(k1, (k, k, cin, cout), jnp.float32) * jnp.sqrt(2.0 / fan_in)
    gamma = 1.0 + 0.1 * jax.random.normal(k2, (cout,), jnp.float32)
    beta = 0.1 * jax.random.normal(k3, (cout,), jnp.float32)
    mean = 0.1 * jax.random.normal(k4, (cout,), jnp.float32)
    var = 1.0 + 0.1 * jax.random.uniform(k5, (cout,), jnp.float32)

    K, N = k * k * cin, cout
    scale = gamma / jnp.sqrt(var + BN_EPS)
    shift = beta - mean * scale
    w2 = w.reshape(K, N) * scale[None, :]              # fold BN scale into weights

    Kp, Np = _round_up(K, 128), _round_up(N, 128)
    tk = _largest_tile(Kp, 128, 512)
    tn = _largest_tile(Np, 128, 256)
    wp = jnp.pad(w2, ((0, Kp - K), (0, Np - N))).astype(jnp.bfloat16)
    bp = jnp.pad(shift, (0, Np - N)).reshape(1, Np).astype(jnp.float32)
    return dict(wp=wp, bp=bp, K=K, N=N, Kp=Kp, Np=Np, tk=tk, tn=tn,
                kh=k, kw=k, stride=stride, padding=padding)


def _prep_fc(w, b):
    K, N = w.shape
    Kp, Np = _round_up(K, 128), _round_up(N, 128)
    tk = _largest_tile(Kp, 128, 512)
    tn = _largest_tile(Np, 128, 256)
    wp = jnp.pad(w, ((0, Kp - K), (0, Np - N))).astype(jnp.bfloat16)
    bp = jnp.pad(b, (0, Np - N)).reshape(1, Np).astype(jnp.float32)
    return dict(wp=wp, bp=bp, K=K, N=N, Kp=Kp, Np=Np, tk=tk, tn=tn)


def init_params(key, in_channels, split_size, num_boxes, num_classes):
    keys = iter(jax.random.split(key, 64))
    layers = []
    cin = in_channels
    for x in architecture_config:
        if isinstance(x, tuple):
            layers.append(("conv", _prep_conv(next(keys), cin, x[1], x[0], x[2], x[3])))
            cin = x[1]
        elif isinstance(x, str):
            layers.append(("maxpool", None))
        elif isinstance(x, list):
            c1, c2, rep = x
            for _ in range(rep):
                layers.append(("conv", _prep_conv(next(keys), cin, c1[1], c1[0], c1[2], c1[3])))
                layers.append(("conv", _prep_conv(next(keys), c1[1], c2[1], c2[0], c2[2], c2[3])))
                cin = c2[1]

    S, B, C = split_size, num_boxes, num_classes
    in1 = 1024 * S * S
    out2 = (B * 5 + C) * S * S
    kf1, kf2, kf3, kf4 = jax.random.split(next(keys), 4)
    fc1_w = jax.random.normal(kf1, (in1, 496), jnp.float32) / jnp.sqrt(in1)
    fc1_b = 0.01 * jax.random.normal(kf2, (496,), jnp.float32)
    fc2_w = jax.random.normal(kf3, (496, out2), jnp.float32) / jnp.sqrt(496.0)
    fc2_b = 0.01 * jax.random.normal(kf4, (out2,), jnp.float32)
    return layers, _prep_fc(fc1_w, fc1_b), _prep_fc(fc2_w, fc2_b)


def yolov1_forward(x_nchw, layers, fc1, fc2):
    # PyTorch input is NCHW -> convert to NHWC bf16 (halves HBM traffic everywhere).
    x = jnp.transpose(x_nchw, (0, 2, 3, 1)).astype(jnp.bfloat16)
    for kind, p in layers:
        x = cnn_block(x, p) if kind == "conv" else maxpool2x2(x)
    N = x.shape[0]
    # match torch.flatten(x, start_dim=1) applied to NCHW.
    feat = jnp.transpose(x, (0, 3, 1, 2)).reshape(N, -1)

    h = fused_matmul(feat, fc1, leaky=True, out_dtype=jnp.bfloat16)
    # Dropout(0.5): identity in eval mode (see TODO at top).
    out = fused_matmul(h, fc2, leaky=False, out_dtype=jnp.float32)
    return out


if __name__ == "__main__":
    key = jax.random.PRNGKey(0)
    kx, kp = jax.random.split(key)
    # Small input: 64x64 spatial -> darknet output is (N, 1, 1, 1024) -> split_size S=1.
    x = jax.random.normal(kx, (2, 3, 64, 64), jnp.float32)
    S, B, C = 1, 2, 3
    layers, fc1, fc2 = init_params(kp, in_channels=3,
                                   split_size=S, num_boxes=B, num_classes=C)
    out = yolov1_forward(x, layers, fc1, fc2)
    out = jax.block_until_ready(out)
    assert out.shape == (2, (B * 5 + C) * S * S), out.shape
    assert bool(jnp.all(jnp.isfinite(out)))
    print("KERNEL_OK")
</pallas_src>

<mosaic_0001>
module attributes {stable_mosaic.version = 11 : i64} {
  func.func @_fused_matmul_kernel(%arg0: i32, %arg1: i32, %arg2: i32, %arg3: memref<512x256xbf16, #tpu.memory_space<vmem>>, %arg4: memref<256x128xbf16, #tpu.memory_space<vmem>>, %arg5: memref<1x128xf32, #tpu.memory_space<vmem>>, %arg6: memref<512x128xbf16, #tpu.memory_space<vmem>>, %arg7: memref<512x128xf32, #tpu.memory_space<vmem>>) attributes {dimension_semantics = [#tpu.dimension_semantics<parallel>, #tpu.dimension_semantics<parallel>, #tpu.dimension_semantics<arbitrary>], iteration_bounds = array<i64: 4, 1, 1>, scalar_prefetch = 0 : i64, scratch_operands = 1 : i64, tpu.core_type = #tpu.core_type<tc>, window_params = [{transform_indices = @transform_0, window_bounds = array<i64: 512, 256>}, {transform_indices = @transform_1, window_bounds = array<i64: 256, 128>}, {transform_indices = @transform_2, window_bounds = array<i64: 1, 128>}, {transform_indices = @transform_3, window_bounds = array<i64: 512, 128>}]} {
    %c0_i32 = arith.constant 0 : i32
    %0 = arith.cmpi eq, %arg2, %c0_i32 : i32
    %1 = arith.extui %0 : i1 to i32
    %c0_i32_0 = arith.constant 0 : i32
    %2 = arith.cmpi ne, %1, %c0_i32_0 : i32
    scf.if %2 {
      %cst_10 = arith.constant 0.000000e+00 : f32
      %12 = vector.broadcast %cst_10 : f32 to vector<512x128xf32>
      %c0_11 = arith.constant 0 : index
      %c0_12 = arith.constant 0 : index
      %13 = vector.load %arg7[%c0_11, %c0_12] : memref<512x128xf32, #tpu.memory_space<vmem>>, vector<512x128xf32>
      tpu.vector_store %arg7[%c0_11, %c0_12], %12 {strides = array<i32>} : memref<512x128xf32, #tpu.memory_space<vmem>>, vector<512x128xf32>,
    } else {
    }
    %c0 = arith.constant 0 : index
    %c0_1 = arith.constant 0 : index
    %3 = vector.load %arg7[%c0, %c0_1] : memref<512x128xf32, #tpu.memory_space<vmem>>, vector<512x128xf32>
    %c0_2 = arith.constant 0 : index
    %c0_3 = arith.constant 0 : index
    %4 = vector.load %arg3[%c0_2, %c0_3] : memref<512x256xbf16, #tpu.memory_space<vmem>>, vector<512x256xbf16>
    %c0_4 = arith.constant 0 : index
    %c0_5 = arith.constant 0 : index
    %5 = vector.load %arg4[%c0_4, %c0_5] : memref<256x128xbf16, #tpu.memory_space<vmem>>, vector<256x128xbf16>
    %cst = arith.constant dense<0.000000e+00> : vector<512x128xf32>
    %6 = tpu.matmul %4, %5, %cst {dimension_numbers = #tpu.dot_dimension_numbers<[1], [0], [0], [1], [0, 0, 1, 1], [], []>} : vector<512x256xbf16>, vector<256x128xbf16>, vector<512x128xf32> -> vector<512x128xf32>
    %7 = arith.addf %3, %6 : vector<512x128xf32>
    %c0_6 = arith.constant 0 : index
    %c0_7 = arith.constant 0 : index
    %8 = vector.load %arg7[%c0_6, %c0_7] : memref<512x128xf32, #tpu.memory_space<vmem>>, vector<512x128xf32>
    tpu.vector_store %arg7[%c0_6, %c0_7], %7 {strides = array<i32>} : memref<512x128xf32, #tpu.memory_space<vmem>>, vector<512x128xf32>,
    %c0_i32_8 = arith.constant 0 : i32
    %9 = arith.cmpi eq, %arg2, %c0_i32_8 : i32
    %10 = arith.extui %9 : i1 to i32
    %c0_i32_9 = arith.constant 0 : i32
    %11 = arith.cmpi ne, %10, %c0_i32_9 : i32
    scf.if %11 {
      %c0_10 = arith.constant 0 : index
      %c0_11 = arith.constant 0 : index
      %12 = vector.load %arg7[%c0_10, %c0_11] : memref<512x128xf32, #tpu.memory_space<vmem>>, vector<512x128xf32>
      %c0_12 = arith.constant 0 : index
      %c0_13 = arith.constant 0 : index
      %13 = vector.load %arg5[%c0_12, %c0_13] : memref<1x128xf32, #tpu.memory_space<vmem>>, vector<1x128xf32>
      %14 = vector.broadcast %13 : vector<1x128xf32> to vector<512x128xf32>
      %15 = arith.addf %12, %14 : vector<512x128xf32>
      %cst_14 = arith.constant 0.000000e+00 : f32
      %16 = vector.broadcast %cst_14 : f32 to vector<512x128xf32>
      %17 = arith.cmpf ogt, %15, %16 : vector<512x128xf32>
      %cst_15 = arith.constant 1.000000e-01 : f32
      %18 = vector.broadcast %cst_15 : f32 to vector<512x128xf32>
      %19 = arith.mulf %18, %15 : vector<512x128xf32>
      %20 = arith.select %17, %15, %19 : vector<512x128xi1>, vector<512x128xf32>
      %21 = arith.truncf %20 : vector<512x128xf32> to vector<512x128xbf16>
      %c0_16 = arith.constant 0 : index
      %c0_17 = arith.constant 0 : index
      %22 = vector.load %arg6[%c0_16, %c0_17] : memref<512x128xbf16, #tpu.memory_space<vmem>>, vector<512x128xbf16>
      tpu.vector_store %arg6[%c0_16, %c0_17], %21 {strides = array<i32>} : memref<512x128xbf16, #tpu.memory_space<vmem>>, vector<512x128xbf16>,
    } else {
    }
    return
  }
  func.func @transform_0(%arg0: i32, %arg1: i32, %arg2: i32) -> (i32, i32) {
    %c0_i32 = arith.constant 0 : i32
    return %arg0, %arg2 : i32, i32
  }
  func.func @transform_1(%arg0: i32, %arg1: i32, %arg2: i32) -> (i32, i32) {
    %c0_i32 = arith.constant 0 : i32
    return %arg2, %arg1 : i32, i32
  }
  func.func @transform_2(%arg0: i32, %arg1: i32, %arg2: i32) -> (i32, i32) {
    %c0_i32 = arith.constant 0 : i32
    %c0_i32_0 = arith.constant 0 : i32
    return %c0_i32, %arg1 : i32, i32
  }
  func.func @transform_3(%arg0: i32, %arg1: i32, %arg2: i32) -> (i32, i32) {
    %c0_i32 = arith.constant 0 : i32
    return %arg0, %arg1 : i32, i32
  }
}

</mosaic_0001>

<bundles_post_ra>
// kernel: tpu_custom_call.1
= control target key start
LH: loop header
LB: loop body
LE: loop exit
PB: predicated region body
PF: predicated region fallthrough
CT: control target
= control target key end

     0   :  { %8 = vsyncpa [#allocation4], 0  ;;  %s3343_s0 = inlined_call_operand.hbm [shape: bf16[2048,256], index: 0, kind: input, shape index: {}]   ;;  %s3344_s1 = inlined_call_operand.hbm [shape: bf16[256,128], index: 1, kind: input, shape index: {}]   ;;  %s3345_s2 = inlined_call_operand.vmem [shape: f32[1,128], index: 2, kind: input, shape index: {}]   ;;  %s3346_s3 = inlined_call_operand.hbm [shape: bf16[2048,128], index: 3, kind: output, shape index: {}]  }
   0x1   :  { %10 = vsyncpa [#allocation4 + $0x1], 0 }
   0x2   :  { %11 = vsyncpa [#allocation7], 0 }
   0x3   :  { %12 = vsyncpa [#allocation5], 0 }
   0x4   :  { %14 = vsyncpa [#allocation5 + $0x1], 0  ;;  %s2923_s12 = smov 0   ;;  %s2925_s13 = smov 0  }
   0x5   :  { %s2927_s14 = smov 0   ;;  %s2929_s15 = smov 0  }
   0x6   :  { %s2931_s16 = smov 0   ;;  %s2933_s17 = smov 0  }
   0x7 LB: > { %s2101_s18 = sadd.s32 4294967295, %s2891_s17   ;;  %s2102_s19 = sadd.s32 4294967294, %s2891_s17   ;;  %s2891_s17 = sphi %s2933_s17, %s20_s17   ;;  %s2887_s16 = sphi %s2931_s16, %s3369_s16   ;;  %s2883_s15 = sphi %s2929_s15, %s3368_s15   ;;  %s2879_s14 = sphi %s2927_s14, %s3367_s14   ;;  %s2875_s13 = sphi %s2925_s13, %s3366_s13   ;;  %s2871_s12 = sphi %s2923_s12, %s3365_s12  }
   0x8   : > { %p61_p0 = scmp.ne.s32.totalorder %s2875_s13, %s2871_s12  ;;  %p2957_p1 = scmp.eq.s32.totalorder %s2101_s18, 0 }
   0x9   : > { %p2961_p2 = scmp.eq.s32.totalorder %s2101_s18, 3  ;;  %p147_p3 = scmp.eq.s32.totalorder %s2102_s19, 3 }
   0xa   : > { %s3351_s20 = scalar_select %p2957_p1, 1, 0 }
   0xb   : > { %s3352_s21 = scalar_select %p2961_p2, 1, 0 }
   0xc   : > { %p2967_p4 = por %p2957_p1, %p61_p0  ;;  %p2103_p5 = scmp.ge.s32.totalorder %s2891_s17, 1 }
   0xd   : > { %p2972_p6 = por %p147_p3, %p61_p0  ;;  %p154_p7 = scmp.lt.s32.totalorder %s2891_s17, 5 }
   0xe   : > { %s3353_s22 = scalar_select %p2967_p4, 1, 0 }
   0xf   : > { %s3354_s23 = scalar_select %p2972_p6, 1, 0 }
  0x10   : > { %p2977_p8 = pnand %p2103_p5, %p154_p7  ;;  %s2893_s25 = smov [#allocation6]  }
  0x11   : > { %s170_s26 = sshll.u32 %s2893_s25, 4  ;;  %s39_s28 = sadd.s32 1, %s2887_s16  ;;  %s171_s26 = int_to_ptr.vmem [resolvable:$true] %s170_s26 }
  0x12   : > { %s3355_s24 = scalar_select %p2977_p8, 1, 0 }
  0x13   : > { %p2563_p9 = pneg %p2977_p8  ;;  %s2747_s4 = scalar_lea.hbm %s3344_s1, 2048 }
  0x14   : > { %p2748_p11 = scmp.ne.s32.totalorder %s3344_s1, %s2747_s4  ;;  %p2754_p3 = scmp.lt.u32.totalorder %s2747_s4, %s3344_s1 }
  0x15   : > { %p2985_p10 = pnand %p2563_p9, %p2957_p1 }
  0x17   : > { %p2749_p12 = pneg %p2985_p10 }
  0x19   : > { %p2750_p13 = pnand %p2749_p12, %p2748_p11 }
  0x1b   : > { %p2751_p0 = pneg %p2750_p13 }
  0x1d   : > { %p2756_p5 = pnand %p2754_p3, %p2751_p0 }
  0x1f   : > { %2759 = shalt.err (!%p2756_p5)
}
  0x20   : > { %s2760_s9 = scalar_lea.vmem %s171_s26, 2048  ;;  %p2768_p1 = scmp.lt.s32.totalorder %s171_s26, %s171_s26 }
  0x21   : > { %p2761_p7 = scmp.ne.s32.totalorder %s171_s26, %s2760_s9  ;;  %p2769_p4 = scmp.lt.s32.totalorder %s2760_s9, %s2760_s9 }
  0x23   : > { %p2763_p9 = pnand %p2761_p7, %p2749_p12  ;;  %p2770_p8 = por %p2769_p4, %p2768_p1 }
  0x25   : > { %p2764_p6 = pneg %p2763_p9 }
  0x27   : > { %p2771_p2 = pnand %p2770_p8, %p2764_p6 }
  0x29   : > { %2774 = shalt.err (!%p2771_p2)
}
  0x2a   : > { %s2894_s10 = smov 64   ;;  %s2895_s11 = smov 4  }
  0x2b   : > { %2566 = dma.hbm_to_vmem [thread:$0]  (!%p2985_p10), %s3344_s1, 2048, %s171_s26, [#allocation7], %s2894_s10, %s2894_s10, %s2895_s11  }
  0x2c   : > { %p41_p1 = scmp.ge.s32.totalorder %s39_s28, 4  ;;  %s48_s25 = sadd.s32 1, %s2879_s14 }
  0x2d   : > { %p55_p2 = scmp.ne.s32.totalorder %s2879_s14, %s2875_s13  ;;  %p56_p4 = scmp.eq.s32.totalorder %s2891_s17, 0 }
  0x2e   : > { %s3371_s28 = smov (%p41_p1, %s39_s28), 0  ;;  %p3358_p8 = scmp.ne.s32.totalorder %s3352_s21, 0 }
  0x2f   : > { %p3012_p6 = por %p56_p4, %p55_p2  ;;  %s43_s27 = ssub.s32 %s2887_s16, %s3371_s28 }
  0x30   : > { %p3018_p11 = por %p3358_p8, %p55_p2  ;;  %p2576_p12 = scmp.lt.s32.totalorder %s2891_s17, 4 }
  0x31   : > { %p46_p10 = scmp.eq.s32.totalorder %s43_s27, 0  ;;  %s190_s26 = sand.u32 1, %s2879_s14  }
  0x32   : > { %s2107_s4 = sshll.u32 %s190_s26, 9  ;;  %s2266_s6 = sshll.u32 %s2887_s16, 13 }
  0x33   : > { %s3027_s5 = scalar_select %p46_p10, %s2879_s14, %s48_s25  }
  0x34   : > { %s3033_s9 = scalar_lea.hbm %s3343_s0, %s2266_s6  ;;  %s194_s21 = scalar_lea.vmem [#allocation3], %s2107_s4 }
  0x35   : > { %s204_s10 = sshll.u32 %s194_s21, 4  ;;  %p3039_p13 = pnand %p2576_p12, %p3012_p6  ;;  %s3035_s10 = int_to_ptr.vmem [resolvable:$true] %s204_s10 }
  0x36   : > { %s3043_s18 = scalar_lea.sflag [#allocation4], %s190_s26  ;;  %s2775_s19 = scalar_lea.hbm %s3033_s9, 8192 }
  0x37   : > { %p2776_p0 = scmp.ne.s32.totalorder %s3033_s9, %s2775_s19  ;;  %p2777_p3 = pneg %p3039_p13 }
  0x38   : > { %s2780_s29 = scalar_lea.hbm %s3343_s0, 32768  ;;  %p2781_p9 = scmp.lt.u32.totalorder %s3033_s9, %s3343_s0 }
  0x39   : > { %p2778_p5 = pnand %p2777_p3, %p2776_p0  ;;  %p2782_p1 = scmp.lt.u32.totalorder %s2780_s29, %s2775_s19 }
  0x3a   : > { %p2784_p4 = scmp.lt.u32.totalorder %s2775_s19, %s3033_s9 }
  0x3b   : > { %p2779_p7 = pneg %p2778_p5  ;;  %p2783_p2 = por %p2782_p1, %p2781_p9 }
  0x3d   : > { %p2785_p6 = por %p2784_p4, %p2783_p2 }
  0x3f   : > { %p2786_p8 = pnand %p2785_p6, %p2779_p7 }
  0x41   : > { %2789 = shalt.err (!%p2786_p8)
}
  0x42   : > { %s2790_s26 = scalar_lea.vmem %s3035_s10, 8192  ;;  %s2896_s7 = smov [#allocation3]  }
  0x43   : > { %p2791_p12 = scmp.ne.s32.totalorder %s3035_s10, %s2790_s26  ;;  %s2795_s8 = sshll.u32 %s2896_s7, 4  ;;  %s2796_s8 = int_to_ptr.vmem [resolvable:$false] %s2795_s8 }
  0x44   : > { %s2797_s21 = scalar_lea.vmem %s2796_s8, 16384  ;;  %p2798_p5 = scmp.lt.s32.totalorder %s3035_s10, %s2796_s8 }
  0x45   : > { %p2793_p10 = pnand %p2791_p12, %p2777_p3  ;;  %p2799_p9 = scmp.lt.s32.totalorder %s2797_s21, %s2790_s26 }
  0x47   : > { %p2794_p0 = pneg %p2793_p10  ;;  %p2800_p1 = por %p2799_p9, %p2798_p5 }
  0x49   : > { %p2801_p2 = pnand %p2800_p1, %p2794_p0 }
  0x4b   : > { %2804 = shalt.err (!%p2801_p2)
}
  0x4c   : > { %s2897_s19 = smov 128   ;;  %s2898_s25 = smov 8  }
  0x4d   : > { %2570 = dma.hbm_to_vmem [thread:$0]  (!%p3039_p13), %s3033_s9, 8192, %s3035_s10, %s3043_s18, %s2897_s19, %s2897_s19, %s2898_s25  }
  0x4e   : > { %p3361_p3 = scmp.ne.s32.totalorder %s3355_s24, 0 }
  0x4f   : > { %s3074_s27 = sand.u32 (!%p3361_p3), 1, %s2875_s13   ;;  %p3362_p7 = scmp.ne.s32.totalorder (!%p3361_p3), %s3353_s22, 0 }
  0x50   : > { %216 = sbr.rel (%p3361_p3) target bundleno = 512 (0x200), region = 32  ;;  %s2112_s29 = sshll.u32 (!%p3361_p3), %s3074_s27, 9 }
  0x51   : > { %s219_s4 = scalar_lea.sflag (!%p3361_p3), [#allocation4], %s3074_s27  ;;  %s3078_s6 = scalar_lea.vmem (!%p3361_p3), [#allocation3], %s2112_s29 }
  0x57   : > { %2858 = dma.done.wait (%p3362_p7), %s219_s4, 8192  }
  0x58   : > { %2860 = vsyncadd (%p3362_p7), %s219_s4, 4294959104  ;;  %p3363_p13 = scmp.ne.s32.totalorder %s3351_s20, 0 }
  0x5a   : > { %2862 = dma.done.wait (%p3363_p13), [#allocation7], 2048  }
  0x5b   : > { %2864 = vsyncadd (%p3363_p13), [#allocation7], 4294965248  ;;  %v2899_v0 = vmov 0   ;;  %v2635_v1 = vld [vmem:[#allocation6] sm:$0xff]   ;;  %v2636_v2 = vld [vmem:[#allocation6 + $0x8] sm:$0xff]   ;;  %s2114_s24 = sshll.u32 %s3074_s27, 8 }
  0x5c   : > { %904 = vmatprep.subr.bf16.mxu0 %v2899_v0  ;;  %2523 = vmatprep.subr.bf16.mxu1 %v2899_v0  ;;  %v2637_v3 = vld [vmem:[#allocation6 + $0x10] sm:$0xff]   ;;  %v2638_v4 = vld [vmem:[#allocation6 + $0x18] sm:$0xff]   ;;  %v2639_v5 = vld [vmem:[#allocation6 + $0x20] sm:$0xff]   ;;  %s3196_s9 = scalar_lea.vmem [#allocation8], %s2114_s24  ;;  %s2331_s10 = sshll.u32 %s2883_s15, 12 }
  0x5d   : > { %905 = vmatpush1.bf16.msra.mxu0 %v2635_v1  ;;  %2539 = vmatpush1.bf16.msra.mxu1 %v2635_v1  ;;  %v2653_v6 = vld [vmem:[%s3078_s6 + $0x4] ss:$8 sps:$4 sm:$0xff]   ;;  %v2641_v9 = vld [vmem:[#allocation6 + $0x30] sm:$0xff]   ;;  %v2642_v10 = vld [vmem:[#allocation6 + $0x38] sm:$0xff]   ;;  %s1986_s11 = sshll.u32 %s3196_s9, 4  ;;  %s3291_s26 = scalar_lea.hbm %s3346_s3, %s2331_s10  ;;  %s3293_s11 = int_to_ptr.vmem [resolvable:$true] %s1986_s11 }
  0x5e   : > { %906 = vmatprep.subr.bf16.mxu0 %v2899_v0  ;;  %2524 = vmatprep.subr.bf16.mxu1 %v2899_v0  ;;  %v2640_v7 = vld [vmem:[#allocation6 + $0x28] sm:$0xff]   ;;  %v2643_v11 = vld [vmem:[#allocation6 + $0x40] sm:$0xff]   ;;  %v2645_v13 = vld [vmem:[#allocation6 + $0x50] sm:$0xff]   ;;  %s1972_s7 = scalar_lea.sflag [#allocation5], %s3074_s27  ;;  %s2805_s8 = scalar_lea.vmem %s3293_s11, 4096 }
  0x5f   : > { %v2656_v8 = vld [vmem:[%s3078_s6 + $0x104] ss:$8 sps:$4 sm:$0xff]   ;;  %936 = vmatprep.mubr.bf16.mxu0 %v2653_v6  ;;  %v2646_v14 = vld [vmem:[#allocation6 + $0x58] sm:$0xff]   ;;  %v2649_v17 = vld [vmem:[#allocation6 + $0x70] sm:$0xff]   ;;  %p2806_p4 = scmp.ne.s32.totalorder %s3293_s11, %s2805_s8  ;;  %s2900_s21 = smov [#allocation8]  }
  0x60   : > { %1064 = vmatprep.mubr.bf16.mxu1 %v2656_v8  ;;  %v2644_v12 = vld [vmem:[#allocation6 + $0x48] sm:$0xff]   ;;  %v2647_v15 = vld [vmem:[#allocation6 + $0x60] sm:$0xff]   ;;  %v2650_v18 = vld [vmem:[#allocation6 + $0x78] sm:$0xff]   ;;  %s2809_s19 = sshll.u32 %s2900_s21, 4  ;;  %s2810_s19 = int_to_ptr.vmem [resolvable:$false] %s2809_s19 }
  0x61   : > { %907 = vmatpush1.bf16.msra.mxu0 %v2636_v2  ;;  %2540 = vmatpush1.bf16.msra.mxu1 %v2636_v2  ;;  %v2648_v16 = vld [vmem:[#allocation6 + $0x68] sm:$0xff]   ;;  %v2657_v21 = vld [vmem:[%s3078_s6 + $0x14] ss:$8 sps:$4 sm:$0xff]   ;;  %v2661_v23 = vld [vmem:[%s3078_s6 + $0x10] ss:$8 sps:$4 sm:$0xff]   ;;  %p2807_p6 = pnand %p2806_p4, %p3018_p11  ;;  %s2811_s25 = scalar_lea.vmem %s2810_s19, 8192 }
  0x62   : > { %908 = vmatprep.subr.bf16.mxu0 %v2899_v0  ;;  %2525 = vmatprep.subr.bf16.mxu1 %v2899_v0  ;;  %v2651_v19 = vld [vmem:[%s3078_s6] ss:$8 sps:$4 sm:$0xff]   ;;  %v2659_v22 = vld [vmem:[%s3078_s6 + $0x114] ss:$8 sps:$4 sm:$0xff]   ;;  %v2662_v24 = vld [vmem:[%s3078_s6 + $0x110] ss:$8 sps:$4 sm:$0xff]   ;;  %p2812_p12 = scmp.lt.s32.totalorder %s3293_s11, %s2810_s19  ;;  %p2813_p10 = scmp.lt.s32.totalorder %s2811_s25, %s2805_s8 }
  0x63   : > { %v2654_v20 = vld [vmem:[%s3078_s6 + $0x100] ss:$8 sps:$4 sm:$0xff]   ;;  %v2663_v25 = vld [vmem:[%s3078_s6 + $0x24] ss:$8 sps:$4 sm:$0xff]   ;;  %v2669_v29 = vld [vmem:[%s3078_s6 + $0x34] ss:$8 sps:$4 sm:$0xff]   ;;  %p2808_p8 = pneg %p2807_p6 }
  0x64   : > { %v2665_v26 = vld [vmem:[%s3078_s6 + $0x124] ss:$8 sps:$4 sm:$0xff]   ;;  %v2667_v27 = vld [vmem:[%s3078_s6 + $0x20] ss:$8 sps:$4 sm:$0xff]   ;;  %v2671_v30 = vld [vmem:[%s3078_s6 + $0x134] ss:$8 sps:$4 sm:$0xff]   ;;  %p2814_p0 = por %p2813_p10, %p2812_p12 }
  0x65   : > { %909 = vmatpush1.bf16.msra.mxu0 %v2637_v3  ;;  %2541 = vmatpush1.bf16.msra.mxu1 %v2637_v3  ;;  %v2668_v28 = vld [vmem:[%s3078_s6 + $0x120] ss:$8 sps:$4 sm:$0xff]   ;;  %v2673_v31 = vld [vmem:[%s3078_s6 + $0x30] ss:$8 sps:$4 sm:$0xff]   ;;  %v2675_v33 = vld [vmem:[%s3078_s6 + $0x44] ss:$8 sps:$4 sm:$0xff]  }
  0x66   : > { %910 = vmatprep.subr.bf16.mxu0 %v2899_v0  ;;  %2526 = vmatprep.subr.bf16.mxu1 %v2899_v0  ;;  %v2674_v32 = vld [vmem:[%s3078_s6 + $0x130] ss:$8 sps:$4 sm:$0xff]   ;;  %v2677_v34 = vld [vmem:[%s3078_s6 + $0x144] ss:$8 sps:$4 sm:$0xff]   ;;  %v2679_v35 = vld [vmem:[%s3078_s6 + $0x40] ss:$8 sps:$4 sm:$0xff]   ;;  %p2815_p5 = pnand %p2814_p0, %p2808_p8 }
  0x67   : > { %v2680_v36 = vld [vmem:[%s3078_s6 + $0x140] ss:$8 sps:$4 sm:$0xff]   ;;  %v2681_v37 = vld [vmem:[%s3078_s6 + $0x54] ss:$8 sps:$4 sm:$0xff]   ;;  %v2685_v39 = vld [vmem:[%s3078_s6 + $0x50] ss:$8 sps:$4 sm:$0xff]  }
  0x68   : > { %v2683_v38 = vld [vmem:[%s3078_s6 + $0x154] ss:$8 sps:$4 sm:$0xff]   ;;  %v2686_v40 = vld [vmem:[%s3078_s6 + $0x150] ss:$8 sps:$4 sm:$0xff]   ;;  %v2687_v41 = vld [vmem:[%s3078_s6 + $0x64] ss:$8 sps:$4 sm:$0xff]  }
  0x69   : > { %911 = vmatpush1.bf16.msra.mxu0 %v2638_v4  ;;  %2542 = vmatpush1.bf16.msra.mxu1 %v2638_v4  ;;  %v2689_v42 = vld [vmem:[%s3078_s6 + $0x164] ss:$8 sps:$4 sm:$0xff]   ;;  %v2691_v43 = vld [vmem:[%s3078_s6 + $0x60] ss:$8 sps:$4 sm:$0xff]   ;;  %v2693_v45 = vld [vmem:[%s3078_s6 + $0x74] ss:$8 sps:$4 sm:$0xff]  }
  0x6a   : > { %912 = vmatprep.subr.bf16.mxu0 %v2899_v0  ;;  %2527 = vmatprep.subr.bf16.mxu1 %v2899_v0  ;;  %v2692_v44 = vld [vmem:[%s3078_s6 + $0x160] ss:$8 sps:$4 sm:$0xff]   ;;  %v2695_v46 = vld [vmem:[%s3078_s6 + $0x174] ss:$8 sps:$4 sm:$0xff]   ;;  %v2697_v47 = vld [vmem:[%s3078_s6 + $0x70] ss:$8 sps:$4 sm:$0xff]  }
  0x6b   : > { %v2698_v48 = vld [vmem:[%s3078_s6 + $0x170] ss:$8 sps:$4 sm:$0xff]   ;;  %v2699_v49 = vld [vmem:[%s3078_s6 + $0x84] ss:$8 sps:$4 sm:$0xff]   ;;  %v2703_v51 = vld [vmem:[%s3078_s6 + $0x80] ss:$8 sps:$4 sm:$0xff]  }
  0x6c   : > { %v2701_v50 = vld [vmem:[%s3078_s6 + $0x184] ss:$8 sps:$4 sm:$0xff]   ;;  %v2704_v52 = vld [vmem:[%s3078_s6 + $0x180] ss:$8 sps:$4 sm:$0xff]   ;;  %v2705_v53 = vld [vmem:[%s3078_s6 + $0x94] ss:$8 sps:$4 sm:$0xff]  }
  0x6d   : > { %913 = vmatpush1.bf16.msra.mxu0 %v2639_v5  ;;  %2543 = vmatpush1.bf16.msra.mxu1 %v2639_v5  ;;  %v2707_v54 = vld [vmem:[%s3078_s6 + $0x194] ss:$8 sps:$4 sm:$0xff]   ;;  %v2709_v55 = vld [vmem:[%s3078_s6 + $0x90] ss:$8 sps:$4 sm:$0xff]   ;;  %v2711_v57 = vld [vmem:[%s3078_s6 + $0xa4] ss:$8 sps:$4 sm:$0xff]  }
  0x6e   : > { %914 = vmatprep.subr.bf16.mxu0 %v2899_v0  ;;  %2528 = vmatprep.subr.bf16.mxu1 %v2899_v0  ;;  %v2710_v56 = vld [vmem:[%s3078_s6 + $0x190] ss:$8 sps:$4 sm:$0xff]   ;;  %v2713_v58 = vld [vmem:[%s3078_s6 + $0x1a4] ss:$8 sps:$4 sm:$0xff]   ;;  %v2715_v59 = vld [vmem:[%s3078_s6 + $0xa0] ss:$8 sps:$4 sm:$0xff]  }
  0x6f   : > { %v2716_v60 = vld [vmem:[%s3078_s6 + $0x1a0] ss:$8 sps:$4 sm:$0xff]   ;;  %v2717_v61 = vld [vmem:[%s3078_s6 + $0xb4] ss:$8 sps:$4 sm:$0xff]   ;;  %v2721_v63 = vld [vmem:[%s3078_s6 + $0xb0] ss:$8 sps:$4 sm:$0xff]  }
  0x70   : > { %v2719_v62 = vld [vmem:[%s3078_s6 + $0x1b4] ss:$8 sps:$4 sm:$0xff]   ;;  %v2723_v1 = vld [vmem:[%s3078_s6 + $0xc4] ss:$8 sps:$4 sm:$0xff]   ;;  %v2727_v3 = vld [vmem:[%s3078_s6 + $0xc0] ss:$8 sps:$4 sm:$0xff]  }
  0x71   : > { %915 = vmatpush1.bf16.msra.mxu0 %v2640_v7  ;;  %2544 = vmatpush1.bf16.msra.mxu1 %v2640_v7  ;;  %v2725_v2 = vld [vmem:[%s3078_s6 + $0x1c4] ss:$8 sps:$4 sm:$0xff]   ;;  %v2728_v4 = vld [vmem:[%s3078_s6 + $0x1c0] ss:$8 sps:$4 sm:$0xff]   ;;  %v2729_v5 = vld [vmem:[%s3078_s6 + $0xd4] ss:$8 sps:$4 sm:$0xff]  }
  0x72   : > { %916 = vmatprep.subr.bf16.mxu0 %v2899_v0  ;;  %2529 = vmatprep.subr.bf16.mxu1 %v2899_v0  ;;  %v2731_v6 = vld [vmem:[%s3078_s6 + $0x1d4] ss:$8 sps:$4 sm:$0xff]   ;;  %v2733_v7 = vld [vmem:[%s3078_s6 + $0xd0] ss:$8 sps:$4 sm:$0xff]  }
  0x73   : > { %v2734_v8 = vld [vmem:[%s3078_s6 + $0x1d0] ss:$8 sps:$4 sm:$0xff]  }
  0x75   : > { %917 = vmatpush1.bf16.msra.mxu0 %v2641_v9  ;;  %2545 = vmatpush1.bf16.msra.mxu1 %v2641_v9  ;;  %v2735_v9 = vld [vmem:[%s3078_s6 + $0xe4] ss:$8 sps:$4 sm:$0xff]  }
  0x76   : > { %918 = vmatprep.subr.bf16.mxu0 %v2899_v0  ;;  %2530 = vmatprep.subr.bf16.mxu1 %v2899_v0 }
  0x79   : > { %919 = vmatpush1.bf16.msra.mxu0 %v2642_v10  ;;  %2546 = vmatpush1.bf16.msra.mxu1 %v2642_v10  ;;  %v2737_v10 = vld [vmem:[%s3078_s6 + $0x1e4] ss:$8 sps:$4 sm:$0xff]  }
  0x7a   : > { %920 = vmatprep.subr.bf16.mxu0 %v2899_v0  ;;  %2531 = vmatprep.subr.bf16.mxu1 %v2899_v0 }
  0x7d   : > { %921 = vmatpush1.bf16.msra.mxu0 %v2643_v11  ;;  %2547 = vmatpush1.bf16.msra.mxu1 %v2643_v11  ;;  %v2739_v11 = vld [vmem:[%s3078_s6 + $0xe0] ss:$8 sps:$4 sm:$0xff]  }
  0x7e   : > { %922 = vmatprep.subr.bf16.mxu0 %v2899_v0  ;;  %2532 = vmatprep.subr.bf16.mxu1 %v2899_v0 }
  0x81   : > { %923 = vmatpush1.bf16.msra.mxu0 %v2644_v12  ;;  %2548 = vmatpush1.bf16.msra.mxu1 %v2644_v12  ;;  %v2740_v12 = vld [vmem:[%s3078_s6 + $0x1e0] ss:$8 sps:$4 sm:$0xff]  }
  0x82   : > { %924 = vmatprep.subr.bf16.mxu0 %v2899_v0  ;;  %2533 = vmatprep.subr.bf16.mxu1 %v2899_v0 }
  0x85   : > { %925 = vmatpush1.bf16.msra.mxu0 %v2645_v13  ;;  %2549 = vmatpush1.bf16.msra.mxu1 %v2645_v13  ;;  %v2741_v13 = vld [vmem:[%s3078_s6 + $0xf4] ss:$8 sps:$4 sm:$0xff]  }
  0x86   : > { %926 = vmatprep.subr.bf16.mxu0 %v2899_v0  ;;  %2534 = vmatprep.subr.bf16.mxu1 %v2899_v0 }
  0x89   : > { %927 = vmatpush1.bf16.msra.mxu0 %v2646_v14  ;;  %2550 = vmatpush1.bf16.msra.mxu1 %v2646_v14  ;;  %v2743_v14 = vld [vmem:[%s3078_s6 + $0x1f4] ss:$8 sps:$4 sm:$0xff]  }
  0x8a   : > { %928 = vmatprep.subr.bf16.mxu0 %v2899_v0  ;;  %2535 = vmatprep.subr.bf16.mxu1 %v2899_v0 }
  0x8d   : > { %929 = vmatpush1.bf16.msra.mxu0 %v2647_v15  ;;  %2551 = vmatpush1.bf16.msra.mxu1 %v2647_v15  ;;  %v2745_v15 = vld [vmem:[%s3078_s6 + $0xf0] ss:$8 sps:$4 sm:$0xff]  }
  0x8e   : > { %930 = vmatprep.subr.bf16.mxu0 %v2899_v0  ;;  %2536 = vmatprep.subr.bf16.mxu1 %v2899_v0 }
  0x91   : > { %931 = vmatpush1.bf16.msra.mxu0 %v2648_v16  ;;  %2552 = vmatpush1.bf16.msra.mxu1 %v2648_v16  ;;  %v2746_v16 = vld [vmem:[%s3078_s6 + $0x1f0] ss:$8 sps:$4 sm:$0xff]  }
  0x92   : > { %932 = vmatprep.subr.bf16.mxu0 %v2899_v0  ;;  %2537 = vmatprep.subr.bf16.mxu1 %v2899_v0 }
  0x95   : > { %933 = vmatpush1.bf16.msra.mxu0 %v2649_v17  ;;  %2553 = vmatpush1.bf16.msra.mxu1 %v2649_v17  ;;  %v3187_v17 = vld [vmem:[%s3345_s2] ss:$0 sm:$0xff] }
  0x96   : > { %934 = vmatprep.subr.bf16.mxu0 %v2899_v0  ;;  %2538 = vmatprep.subr.bf16.mxu1 %v2899_v0  ;;  %v2722_v0 = vld [vmem:[%s3078_s6 + $0x1b0] ss:$8 sps:$4 sm:$0xff]  }
  0x99   : > { %935 = vmatpush1.bf16.msra.mxu0 %v2650_v18  ;;  %2554 = vmatpush1.bf16.msra.mxu1 %v2650_v18 }
  0x9c   : > { %937 = vmatmul.mubr.bf16.vlgmr.msra.gmra.mrb[0].mxu0 %v2651_v19  ;;  %1065 = vmatmul.mubr.bf16.vlgmr.msra.gmra.mrb[0].mxu1 %v2654_v20 }
  0x9d   : > { %944 = vmatprep.mubr.bf16.mxu0 %v2657_v21  ;;  %1072 = vmatprep.mubr.bf16.mxu1 %v2659_v22 }
  0xa4   : > { %945 = vmatmul.mubr.bf16.gmra.mrb[4].mxu0 %v2661_v23  ;;  %1073 = vmatmul.mubr.bf16.gmra.mrb[4].mxu1 %v2662_v24 }
  0xa5   : > { %952 = vmatprep.mubr.bf16.mxu0 %v2663_v25  ;;  %1080 = vmatprep.mubr.bf16.mxu1 %v2665_v26 }
  0xac   : > { %953 = vmatmul.mubr.bf16.gmra.mrb[8].mxu0 %v2667_v27  ;;  %1081 = vmatmul.mubr.bf16.gmra.mrb[8].mxu1 %v2668_v28 }
  0xad   : > { %960 = vmatprep.mubr.bf16.mxu0 %v2669_v29  ;;  %1088 = vmatprep.mubr.bf16.mxu1 %v2671_v30 }
  0xb4   : > { %961 = vmatmul.mubr.bf16.gmra.mrb[12].mxu0 %v2673_v31  ;;  %1089 = vmatmul.mubr.bf16.gmra.mrb[12].mxu1 %v2674_v32 }
  0xb5   : > { %968 = vmatprep.mubr.bf16.mxu0 %v2675_v33  ;;  %1096 = vmatprep.mubr.bf16.mxu1 %v2677_v34 }
  0xbc   : > { %969 = vmatmul.mubr.bf16.gmra.mrb[16].mxu0 %v2679_v35  ;;  %1097 = vmatmul.mubr.bf16.gmra.mrb[16].mxu1 %v2680_v36 }
  0xbd   : > { %976 = vmatprep.mubr.bf16.mxu0 %v2681_v37  ;;  %1104 = vmatprep.mubr.bf16.mxu1 %v2683_v38 }
  0xc4   : > { %977 = vmatmul.mubr.bf16.gmra.mrb[20].mxu0 %v2685_v39  ;;  %1105 = vmatmul.mubr.bf16.gmra.mrb[20].mxu1 %v2686_v40 }
  0xc5   : > { %984 = vmatprep.mubr.bf16.mxu0 %v2687_v41  ;;  %1112 = vmatprep.mubr.bf16.mxu1 %v2689_v42 }
  0xcc   : > { %985 = vmatmul.mubr.bf16.gmra.mrb[24].mxu0 %v2691_v43  ;;  %1113 = vmatmul.mubr.bf16.gmra.mrb[24].mxu1 %v2692_v44 }
  0xcd   : > { %992 = vmatprep.mubr.bf16.mxu0 %v2693_v45  ;;  %1120 = vmatprep.mubr.bf16.mxu1 %v2695_v46 }
  0xd4   : > { %993 = vmatmul.mubr.bf16.gmra.mrb[28].mxu0 %v2697_v47  ;;  %1121 = vmatmul.mubr.bf16.gmra.mrb[28].mxu1 %v2698_v48 }
  0xd5   : > { %1000 = vmatprep.mubr.bf16.mxu0 %v2699_v49  ;;  %1128 = vmatprep.mubr.bf16.mxu1 %v2701_v50 }
  0xdc   : > { %1001 = vmatmul.mubr.bf16.gmra.mrb[32].mxu0 %v2703_v51  ;;  %1129 = vmatmul.mubr.bf16.gmra.mrb[32].mxu1 %v2704_v52 }
  0xdd   : > { %1008 = vmatprep.mubr.bf16.mxu0 %v2705_v53  ;;  %1136 = vmatprep.mubr.bf16.mxu1 %v2707_v54 }
  0xe4   : > { %1009 = vmatmul.mubr.bf16.gmra.mrb[36].mxu0 %v2709_v55  ;;  %1137 = vmatmul.mubr.bf16.gmra.mrb[36].mxu1 %v2710_v56 }
  0xe5   : > { %1016 = vmatprep.mubr.bf16.mxu0 %v2711_v57  ;;  %1144 = vmatprep.mubr.bf16.mxu1 %v2713_v58 }
  0xec   : > { %1017 = vmatmul.mubr.bf16.gmra.mrb[40].mxu0 %v2715_v59  ;;  %1145 = vmatmul.mubr.bf16.gmra.mrb[40].mxu1 %v2716_v60 }
  0xed   : > { %1024 = vmatprep.mubr.bf16.mxu0 %v2717_v61  ;;  %1152 = vmatprep.mubr.bf16.mxu1 %v2719_v62 }
  0xf4   : > { %1025 = vmatmul.mubr.bf16.gmra.mrb[44].mxu0 %v2721_v63  ;;  %1153 = vmatmul.mubr.bf16.gmra.mrb[44].mxu1 %v2722_v0 }
  0xf5   : > { %1032 = vmatprep.mubr.bf16.mxu0 %v2723_v1  ;;  %1160 = vmatprep.mubr.bf16.mxu1 %v2725_v2 }
  0xfc   : > { %1033 = vmatmul.mubr.bf16.gmra.mrb[48].mxu0 %v2727_v3  ;;  %1161 = vmatmul.mubr.bf16.gmra.mrb[48].mxu1 %v2728_v4 }
  0xfd   : > { %1040 = vmatprep.mubr.bf16.mxu0 %v2729_v5  ;;  %1168 = vmatprep.mubr.bf16.mxu1 %v2731_v6 }
 0x104   : > { %1041 = vmatmul.mubr.bf16.gmra.mrb[52].mxu0 %v2733_v7  ;;  %1169 = vmatmul.mubr.bf16.gmra.mrb[52].mxu1 %v2734_v8 }
 0x105   : > { %1048 = vmatprep.mubr.bf16.mxu0 %v2735_v9  ;;  %1176 = vmatprep.mubr.bf16.mxu1 %v2737_v10 }
 0x10c   : > { %1049 = vmatmul.mubr.bf16.gmra.mrb[56].mxu0 %v2739_v11  ;;  %1177 = vmatmul.mubr.bf16.gmra.mrb[56].mxu1 %v2740_v12 }
 0x10d   : > { %1056 = vmatprep.mubr.bf16.mxu0 %v2741_v13  ;;  %1184 = vmatprep.mubr.bf16.mxu1 %v2743_v14 }
 0x114   : > { %1057 = vmatmul.mubr.bf16.gmra.mrb[60].mxu0 %v2745_v15  ;;  %1185 = vmatmul.mubr.bf16.gmra.mrb[60].mxu1 %v2746_v16 }
 0x16f   : > { %v938_v18 = vpop.f32.mrb[0].mxu0  ;;  %v1066_v19 = vpop.f32.mrb[0].mxu1 }
 0x170   : > { %v1395_v20 = vadd.f32 %v3187_v17, %v938_v18  ;;  %v1427_v21 = vadd.f32 %v3187_v17, %v1066_v19  ;;  %v940_v22 = vpop.f32.mrb[1].mxu0  ;;  %v1068_v23 = vpop.f32.mrb[1].mxu1 }
 0x171   : > { %v941_v24 = vpop.f32.mrb[2].mxu0  ;;  %v1069_v25 = vpop.f32.mrb[2].mxu1 }
 0x172   : > { %v1523_v26 = vmul.f32 0.1, %v1395_v20  ;;  %v1555_v27 = vmul.f32 0.1, %v1427_v21  ;;  %v1396_v28 = vadd.f32 %v3187_v17, %v941_v24  ;;  %v1428_v29 = vadd.f32 %v3187_v17, %v1069_v25  ;;  %v943_v30 = vpop.f32.mrb[3].mxu0  ;;  %v1071_v31 = vpop.f32.mrb[3].mxu1 }
 0x173   : > { %vm1459_vm0 = vcmp.gt.f32.partialorder %v1395_v20, 0.0  ;;  %vm1491_vm1 = vcmp.gt.f32.partialorder %v1427_v21, 0.0 }
 0x174   : > { %vm1460_vm2 = vcmp.gt.f32.partialorder %v1396_v28, 0.0  ;;  %v1524_v32 = vmul.f32 0.1, %v1396_v28  ;;  %vm1492_vm3 = vcmp.gt.f32.partialorder %v1428_v29, 0.0  ;;  %v1556_v33 = vmul.f32 0.1, %v1428_v29 }
 0x175   : > { %v1587_v34 = vsel %vm1459_vm0, %v1395_v20, %v1523_v26  ;;  %v1619_v35 = vsel %vm1491_vm1, %v1427_v21, %v1555_v27 }
 0x176   : > { %v1588_v36 = vsel %vm1460_vm2, %v1396_v28, %v1524_v32  ;;  %v1620_v37 = vsel %vm1492_vm3, %v1428_v29, %v1556_v33 }
 0x177   : > { %v946_v38 = vpop.f32.mrb[4].mxu0  ;;  %v1074_v39 = vpop.f32.mrb[4].mxu1  ;;  %v2335_v40 = vpack.c.bf16 %v1588_v36, %v1587_v34  ;;  %v2415_v41 = vpack.c.bf16 %v1620_v37, %v1619_v35 }
 0x178   : > { %v1397_v42 = vadd.f32 %v3187_v17, %v946_v38  ;;  %v1429_v43 = vadd.f32 %v3187_v17, %v1074_v39  ;;  %v948_v44 = vpop.f32.mrb[5].mxu0  ;;  %v1076_v45 = vpop.f32.mrb[5].mxu1 }
 0x179   : > { %v949_v46 = vpop.f32.mrb[6].mxu0  ;;  %v1077_v47 = vpop.f32.mrb[6].mxu1  ;;  %2336 = vst [vmem:[%s3196_s9] sm:$0xff] %v2335_v40   ;;  %2507 = vst [vmem:[%s3196_s9 + $0x80] sm:$0xff] %v2415_v41  }
 0x17a   : > { %v1525_v48 = vmul.f32 0.1, %v1397_v42  ;;  %v1557_v49 = vmul.f32 0.1, %v1429_v43  ;;  %v1398_v50 = vadd.f32 %v3187_v17, %v949_v46  ;;  %v1430_v51 = vadd.f32 %v3187_v17, %v1077_v47  ;;  %v951_v52 = vpop.f32.mrb[7].mxu0  ;;  %v1079_v53 = vpop.f32.mrb[7].mxu1 }
 0x17b   : > { %vm1461_vm4 = vcmp.gt.f32.partialorder %v1397_v42, 0.0  ;;  %vm1493_vm5 = vcmp.gt.f32.partialorder %v1429_v43, 0.0 }
 0x17c   : > { %vm1462_vm6 = vcmp.gt.f32.partialorder %v1398_v50, 0.0  ;;  %v1526_v54 = vmul.f32 0.1, %v1398_v50  ;;  %vm1494_vm7 = vcmp.gt.f32.partialorder %v1430_v51, 0.0  ;;  %v1558_v55 = vmul.f32 0.1, %v1430_v51 }
 0x17d   : > { %v1589_v56 = vsel %vm1461_vm4, %v1397_v42, %v1525_v48  ;;  %v1621_v57 = vsel %vm1493_vm5, %v1429_v43, %v1557_v49 }
 0x17e   : > { %v1590_v58 = vsel %vm1462_vm6, %v1398_v50, %v1526_v54  ;;  %v1622_v59 = vsel %vm1494_vm7, %v1430_v51, %v1558_v55 }
 0x17f   : > { %v954_v60 = vpop.f32.mrb[8].mxu0  ;;  %v1082_v61 = vpop.f32.mrb[8].mxu1  ;;  %v2340_v62 = vpack.c.bf16 %v1590_v58, %v1589_v56  ;;  %v2420_v63 = vpack.c.bf16 %v1622_v59, %v1621_v57 }
 0x180   : > { %v1399_v0 = vadd.f32 %v3187_v17, %v954_v60  ;;  %v1431_v1 = vadd.f32 %v3187_v17, %v1082_v61  ;;  %v956_v2 = vpop.f32.mrb[9].mxu0  ;;  %v1084_v3 = vpop.f32.mrb[9].mxu1 }
 0x181   : > { %v957_v4 = vpop.f32.mrb[10].mxu0  ;;  %v1085_v5 = vpop.f32.mrb[10].mxu1  ;;  %2492 = vst [vmem:[%s3196_s9 + $0x8] sm:$0xff] %v2340_v62   ;;  %2508 = vst [vmem:[%s3196_s9 + $0x88] sm:$0xff] %v2420_v63  }
 0x182   : > { %v1527_v6 = vmul.f32 0.1, %v1399_v0  ;;  %v1559_v7 = vmul.f32 0.1, %v1431_v1  ;;  %v1400_v8 = vadd.f32 %v3187_v17, %v957_v4  ;;  %v1432_v9 = vadd.f32 %v3187_v17, %v1085_v5  ;;  %v959_v10 = vpop.f32.mrb[11].mxu0  ;;  %v1087_v11 = vpop.f32.mrb[11].mxu1 }
 0x183   : > { %vm1463_vm8 = vcmp.gt.f32.partialorder %v1399_v0, 0.0  ;;  %vm1495_vm9 = vcmp.gt.f32.partialorder %v1431_v1, 0.0 }
 0x184   : > { %vm1464_vm10 = vcmp.gt.f32.partialorder %v1400_v8, 0.0  ;;  %v1528_v12 = vmul.f32 0.1, %v1400_v8  ;;  %vm1496_vm11 = vcmp.gt.f32.partialorder %v1432_v9, 0.0  ;;  %v1560_v13 = vmul.f32 0.1, %v1432_v9 }
 0x185   : > { %v1591_v14 = vsel %vm1463_vm8, %v1399_v0, %v1527_v6  ;;  %v1623_v15 = vsel %vm1495_vm9, %v1431_v1, %v1559_v7 }
 0x186   : > { %v1592_v16 = vsel %vm1464_vm10, %v1400_v8, %v1528_v12  ;;  %v1624_v18 = vsel %vm1496_vm11, %v1432_v9, %v1560_v13 }
 0x187   : > { %v962_v19 = vpop.f32.mrb[12].mxu0  ;;  %v1090_v20 = vpop.f32.mrb[12].mxu1  ;;  %v2345_v21 = vpack.c.bf16 %v1592_v16, %v1591_v14  ;;  %v2425_v22 = vpack.c.bf16 %v1624_v18, %v1623_v15 }
 0x188   : > { %v1401_v23 = vadd.f32 %v3187_v17, %v962_v19  ;;  %v1433_v24 = vadd.f32 %v3187_v17, %v1090_v20  ;;  %v964_v25 = vpop.f32.mrb[13].mxu0  ;;  %v1092_v26 = vpop.f32.mrb[13].mxu1 }
 0x189   : > { %v965_v27 = vpop.f32.mrb[14].mxu0  ;;  %v1093_v28 = vpop.f32.mrb[14].mxu1  ;;  %2493 = vst [vmem:[%s3196_s9 + $0x10] sm:$0xff] %v2345_v21   ;;  %2509 = vst [vmem:[%s3196_s9 + $0x90] sm:$0xff] %v2425_v22  }
 0x18a   : > { %v1529_v29 = vmul.f32 0.1, %v1401_v23  ;;  %v1561_v30 = vmul.f32 0.1, %v1433_v24  ;;  %v1402_v31 = vadd.f32 %v3187_v17, %v965_v27  ;;  %v1434_v32 = vadd.f32 %v3187_v17, %v1093_v28  ;;  %v967_v33 = vpop.f32.mrb[15].mxu0  ;;  %v1095_v34 = vpop.f32.mrb[15].mxu1 }
 0x18b   : > { %vm1465_vm12 = vcmp.gt.f32.partialorder %v1401_v23, 0.0  ;;  %vm1497_vm13 = vcmp.gt.f32.partialorder %v1433_v24, 0.0 }
 0x18c   : > { %vm1466_vm14 = vcmp.gt.f32.partialorder %v1402_v31, 0.0  ;;  %v1530_v35 = vmul.f32 0.1, %v1402_v31  ;;  %vm1498_vm15 = vcmp.gt.f32.partialorder %v1434_v32, 0.0  ;;  %v1562_v36 = vmul.f32 0.1, %v1434_v32 }
 0x18d   : > { %v1593_v37 = vsel %vm1465_vm12, %v1401_v23, %v1529_v29  ;;  %v1625_v38 = vsel %vm1497_vm13, %v1433_v24, %v1561_v30 }
 0x18e   : > { %v1594_v39 = vsel %vm1466_vm14, %v1402_v31, %v1530_v35  ;;  %v1626_v40 = vsel %vm1498_vm15, %v1434_v32, %v1562_v36 }
 0x18f   : > { %v970_v41 = vpop.f32.mrb[16].mxu0  ;;  %v1098_v42 = vpop.f32.mrb[16].mxu1  ;;  %v2350_v43 = vpack.c.bf16 %v1594_v39, %v1593_v37  ;;  %v2430_v44 = vpack.c.bf16 %v1626_v40, %v1625_v38 }
 0x190   : > { %v1403_v45 = vadd.f32 %v3187_v17, %v970_v41  ;;  %v1435_v46 = vadd.f32 %v3187_v17, %v1098_v42  ;;  %v972_v47 = vpop.f32.mrb[17].mxu0  ;;  %v1100_v48 = vpop.f32.mrb[17].mxu1 }
 0x191   : > { %v973_v49 = vpop.f32.mrb[18].mxu0  ;;  %v1101_v50 = vpop.f32.mrb[18].mxu1  ;;  %2494 = vst [vmem:[%s3196_s9 + $0x18] sm:$0xff] %v2350_v43   ;;  %2510 = vst [vmem:[%s3196_s9 + $0x98] sm:$0xff] %v2430_v44  }
 0x192   : > { %v1531_v51 = vmul.f32 0.1, %v1403_v45  ;;  %v1563_v52 = vmul.f32 0.1, %v1435_v46  ;;  %v1404_v53 = vadd.f32 %v3187_v17, %v973_v49  ;;  %v1436_v54 = vadd.f32 %v3187_v17, %v1101_v50  ;;  %v975_v55 = vpop.f32.mrb[19].mxu0  ;;  %v1103_v56 = vpop.f32.mrb[19].mxu1 }
 0x193   : > { %vm1467_vm0 = vcmp.gt.f32.partialorder %v1403_v45, 0.0  ;;  %vm1499_vm1 = vcmp.gt.f32.partialorder %v1435_v46, 0.0 }
 0x194   : > { %vm1468_vm2 = vcmp.gt.f32.partialorder %v1404_v53, 0.0  ;;  %v1532_v57 = vmul.f32 0.1, %v1404_v53  ;;  %vm1500_vm3 = vcmp.gt.f32.partialorder %v1436_v54, 0.0  ;;  %v1564_v58 = vmul.f32 0.1, %v1436_v54 }
 0x195   : > { %v1595_v59 = vsel %vm1467_vm0, %v1403_v45, %v1531_v51  ;;  %v1627_v60 = vsel %vm1499_vm1, %v1435_v46, %v1563_v52 }
 0x196   : > { %v1596_v61 = vsel %vm1468_vm2, %v1404_v53, %v1532_v57  ;;  %v1628_v62 = vsel %vm1500_vm3, %v1436_v54, %v1564_v58 }
 0x197   : > { %v978_v63 = vpop.f32.mrb[20].mxu0  ;;  %v1106_v0 = vpop.f32.mrb[20].mxu1  ;;  %v2355_v1 = vpack.c.bf16 %v1596_v61, %v1595_v59  ;;  %v2435_v2 = vpack.c.bf16 %v1628_v62, %v1627_v60 }
 0x198   : > { %v1405_v3 = vadd.f32 %v3187_v17, %v978_v63  ;;  %v1437_v4 = vadd.f32 %v3187_v17, %v1106_v0  ;;  %v980_v5 = vpop.f32.mrb[21].mxu0  ;;  %v1108_v6 = vpop.f32.mrb[21].mxu1 }
 0x199   : > { %v981_v7 = vpop.f32.mrb[22].mxu0  ;;  %v1109_v8 = vpop.f32.mrb[22].mxu1  ;;  %2495 = vst [vmem:[%s3196_s9 + $0x20] sm:$0xff] %v2355_v1   ;;  %2511 = vst [vmem:[%s3196_s9 + $0xa0] sm:$0xff] %v2435_v2  }
 0x19a   : > { %v1533_v9 = vmul.f32 0.1, %v1405_v3  ;;  %v1565_v10 = vmul.f32 0.1, %v1437_v4  ;;  %v1406_v11 = vadd.f32 %v3187_v17, %v981_v7  ;;  %v1438_v12 = vadd.f32 %v3187_v17, %v1109_v8  ;;  %v983_v13 = vpop.f32.mrb[23].mxu0  ;;  %v1111_v14 = vpop.f32.mrb[23].mxu1 }
 0x19b   : > { %vm1469_vm4 = vcmp.gt.f32.partialorder %v1405_v3, 0.0  ;;  %vm1501_vm5 = vcmp.gt.f32.partialorder %v1437_v4, 0.0 }
 0x19c   : > { %vm1470_vm6 = vcmp.gt.f32.partialorder %v1406_v11, 0.0  ;;  %v1534_v15 = vmul.f32 0.1, %v1406_v11  ;;  %vm1502_vm7 = vcmp.gt.f32.partialorder %v1438_v12, 0.0  ;;  %v1566_v16 = vmul.f32 0.1, %v1438_v12 }
 0x19d   : > { %v1597_v18 = vsel %vm1469_vm4, %v1405_v3, %v1533_v9  ;;  %v1629_v19 = vsel %vm1501_vm5, %v1437_v4, %v1565_v10 }
 0x19e   : > { %v1598_v20 = vsel %vm1470_vm6, %v1406_v11, %v1534_v15  ;;  %v1630_v21 = vsel %vm1502_vm7, %v1438_v12, %v1566_v16 }
 0x19f   : > { %v986_v22 = vpop.f32.mrb[24].mxu0  ;;  %v1114_v23 = vpop.f32.mrb[24].mxu1  ;;  %v2360_v24 = vpack.c.bf16 %v1598_v20, %v1597_v18  ;;  %v2440_v25 = vpack.c.bf16 %v1630_v21, %v1629_v19 }
 0x1a0   : > { %v1407_v26 = vadd.f32 %v3187_v17, %v986_v22  ;;  %v1439_v27 = vadd.f32 %v3187_v17, %v1114_v23  ;;  %v988_v28 = vpop.f32.mrb[25].mxu0  ;;  %v1116_v29 = vpop.f32.mrb[25].mxu1 }
 0x1a1   : > { %v989_v30 = vpop.f32.mrb[26].mxu0  ;;  %v1117_v31 = vpop.f32.mrb[26].mxu1  ;;  %2496 = vst [vmem:[%s3196_s9 + $0x28] sm:$0xff] %v2360_v24   ;;  %2512 = vst [vmem:[%s3196_s9 + $0xa8] sm:$0xff] %v2440_v25  }
 0x1a2   : > { %v1535_v32 = vmul.f32 0.1, %v1407_v26  ;;  %v1567_v33 = vmul.f32 0.1, %v1439_v27  ;;  %v1408_v34 = vadd.f32 %v3187_v17, %v989_v30  ;;  %v1440_v35 = vadd.f32 %v3187_v17, %v1117_v31  ;;  %v991_v36 = vpop.f32.mrb[27].mxu0  ;;  %v1119_v37 = vpop.f32.mrb[27].mxu1 }
 0x1a3   : > { %vm1471_vm8 = vcmp.gt.f32.partialorder %v1407_v26, 0.0  ;;  %vm1503_vm9 = vcmp.gt.f32.partialorder %v1439_v27, 0.0 }
 0x1a4   : > { %vm1472_vm10 = vcmp.gt.f32.partialorder %v1408_v34, 0.0  ;;  %v1536_v38 = vmul.f32 0.1, %v1408_v34  ;;  %vm1504_vm11 = vcmp.gt.f32.partialorder %v1440_v35, 0.0  ;;  %v1568_v39 = vmul.f32 0.1, %v1440_v35 }
 0x1a5   : > { %v1599_v40 = vsel %vm1471_vm8, %v1407_v26, %v1535_v32  ;;  %v1631_v41 = vsel %vm1503_vm9, %v1439_v27, %v1567_v33 }
 0x1a6   : > { %v1600_v42 = vsel %vm1472_vm10, %v1408_v34, %v1536_v38  ;;  %v1632_v43 = vsel %vm1504_vm11, %v1440_v35, %v1568_v39 }
 0x1a7   : > { %v994_v44 = vpop.f32.mrb[28].mxu0  ;;  %v1122_v45 = vpop.f32.mrb[28].mxu1  ;;  %v2365_v46 = vpack.c.bf16 %v1600_v42, %v1599_v40  ;;  %v2445_v47 = vpack.c.bf16 %v1632_v43, %v1631_v41 }
 0x1a8   : > { %v1409_v48 = vadd.f32 %v3187_v17, %v994_v44  ;;  %v1441_v49 = vadd.f32 %v3187_v17, %v1122_v45  ;;  %v996_v50 = vpop.f32.mrb[29].mxu0  ;;  %v1124_v51 = vpop.f32.mrb[29].mxu1 }
 0x1a9   : > { %v997_v52 = vpop.f32.mrb[30].mxu0  ;;  %v1125_v53 = vpop.f32.mrb[30].mxu1  ;;  %2497 = vst [vmem:[%s3196_s9 + $0x30] sm:$0xff] %v2365_v46   ;;  %2513 = vst [vmem:[%s3196_s9 + $0xb0] sm:$0xff] %v2445_v47  }
 0x1aa   : > { %v1537_v54 = vmul.f32 0.1, %v1409_v48  ;;  %v1569_v55 = vmul.f32 0.1, %v1441_v49  ;;  %v1410_v56 = vadd.f32 %v3187_v17, %v997_v52  ;;  %v1442_v57 = vadd.f32 %v3187_v17, %v1125_v53  ;;  %v999_v58 = vpop.f32.mrb[31].mxu0  ;;  %v1127_v59 = vpop.f32.mrb[31].mxu1 }
 0x1ab   : > { %vm1473_vm12 = vcmp.gt.f32.partialorder %v1409_v48, 0.0  ;;  %vm1505_vm13 = vcmp.gt.f32.partialorder %v1441_v49, 0.0 }
 0x1ac   : > { %vm1474_vm14 = vcmp.gt.f32.partialorder %v1410_v56, 0.0  ;;  %v1538_v60 = vmul.f32 0.1, %v1410_v56  ;;  %vm1506_vm15 = vcmp.gt.f32.partialorder %v1442_v57, 0.0  ;;  %v1570_v61 = vmul.f32 0.1, %v1442_v57 }
 0x1ad   : > { %v1601_v62 = vsel %vm1473_vm12, %v1409_v48, %v1537_v54  ;;  %v1633_v63 = vsel %vm1505_vm13, %v1441_v49, %v1569_v55 }
 0x1ae   : > { %v1602_v0 = vsel %vm1474_vm14, %v1410_v56, %v1538_v60  ;;  %v1634_v1 = vsel %vm1506_vm15, %v1442_v57, %v1570_v61 }
 0x1af   : > { %v1002_v2 = vpop.f32.mrb[32].mxu0  ;;  %v1130_v3 = vpop.f32.mrb[32].mxu1  ;;  %v2370_v4 = vpack.c.bf16 %v1602_v0, %v1601_v62  ;;  %v2450_v5 = vpack.c.bf16 %v1634_v1, %v1633_v63 }
 0x1b0   : > { %v1411_v6 = vadd.f32 %v3187_v17, %v1002_v2  ;;  %v1443_v7 = vadd.f32 %v3187_v17, %v1130_v3  ;;  %v1004_v8 = vpop.f32.mrb[33].mxu0  ;;  %v1132_v9 = vpop.f32.mrb[33].mxu1 }
 0x1b1   : > { %v1005_v10 = vpop.f32.mrb[34].mxu0  ;;  %v1133_v11 = vpop.f32.mrb[34].mxu1  ;;  %2498 = vst [vmem:[%s3196_s9 + $0x38] sm:$0xff] %v2370_v4   ;;  %2514 = vst [vmem:[%s3196_s9 + $0xb8] sm:$0xff] %v2450_v5  }
 0x1b2   : > { %v1539_v12 = vmul.f32 0.1, %v1411_v6  ;;  %v1571_v13 = vmul.f32 0.1, %v1443_v7  ;;  %v1412_v14 = vadd.f32 %v3187_v17, %v1005_v10  ;;  %v1444_v15 = vadd.f32 %v3187_v17, %v1133_v11  ;;  %v1007_v16 = vpop.f32.mrb[35].mxu0  ;;  %v1135_v18 = vpop.f32.mrb[35].mxu1 }
 0x1b3   : > { %vm1475_vm0 = vcmp.gt.f32.partialorder %v1411_v6, 0.0  ;;  %vm1507_vm1 = vcmp.gt.f32.partialorder %v1443_v7, 0.0 }
 0x1b4   : > { %vm1476_vm2 = vcmp.gt.f32.partialorder %v1412_v14, 0.0  ;;  %v1540_v19 = vmul.f32 0.1, %v1412_v14  ;;  %vm1508_vm3 = vcmp.gt.f32.partialorder %v1444_v15, 0.0  ;;  %v1572_v20 = vmul.f32 0.1, %v1444_v15 }
 0x1b5   : > { %v1603_v21 = vsel %vm1475_vm0, %v1411_v6, %v1539_v12  ;;  %v1635_v22 = vsel %vm1507_vm1, %v1443_v7, %v1571_v13 }
 0x1b6   : > { %v1604_v23 = vsel %vm1476_vm2, %v1412_v14, %v1540_v19  ;;  %v1636_v24 = vsel %vm1508_vm3, %v1444_v15, %v1572_v20 }
 0x1b7   : > { %v1010_v25 = vpop.f32.mrb[36].mxu0  ;;  %v1138_v26 = vpop.f32.mrb[36].mxu1  ;;  %v2375_v27 = vpack.c.bf16 %v1604_v23, %v1603_v21  ;;  %v2455_v28 = vpack.c.bf16 %v1636_v24, %v1635_v22 }
 0x1b8   : > { %v1413_v29 = vadd.f32 %v3187_v17, %v1010_v25  ;;  %v1445_v30 = vadd.f32 %v3187_v17, %v1138_v26  ;;  %v1012_v31 = vpop.f32.mrb[37].mxu0  ;;  %v1140_v32 = vpop.f32.mrb[37].mxu1 }
 0x1b9   : > { %v1013_v33 = vpop.f32.mrb[38].mxu0  ;;  %v1141_v34 = vpop.f32.mrb[38].mxu1  ;;  %2499 = vst [vmem:[%s3196_s9 + $0x40] sm:$0xff] %v2375_v27   ;;  %2515 = vst [vmem:[%s3196_s9 + $0xc0] sm:$0xff] %v2455_v28  }
 0x1ba   : > { %v1541_v35 = vmul.f32 0.1, %v1413_v29  ;;  %v1573_v36 = vmul.f32 0.1, %v1445_v30  ;;  %v1414_v37 = vadd.f32 %v3187_v17, %v1013_v33  ;;  %v1446_v38 = vadd.f32 %v3187_v17, %v1141_v34  ;;  %v1015_v39 = vpop.f32.mrb[39].mxu0  ;;  %v1143_v40 = vpop.f32.mrb[39].mxu1 }
 0x1bb   : > { %vm1477_vm4 = vcmp.gt.f32.partialorder %v1413_v29, 0.0  ;;  %vm1509_vm5 = vcmp.gt.f32.partialorder %v1445_v30, 0.0 }
 0x1bc   : > { %vm1478_vm6 = vcmp.gt.f32.partialorder %v1414_v37, 0.0  ;;  %v1542_v41 = vmul.f32 0.1, %v1414_v37  ;;  %vm1510_vm7 = vcmp.gt.f32.partialorder %v1446_v38, 0.0  ;;  %v1574_v42 = vmul.f32 0.1, %v1446_v38 }
 0x1bd   : > { %v1605_v43 = vsel %vm1477_vm4, %v1413_v29, %v1541_v35  ;;  %v1637_v44 = vsel %vm1509_vm5, %v1445_v30, %v1573_v36 }
 0x1be   : > { %v1606_v45 = vsel %vm1478_vm6, %v1414_v37, %v1542_v41  ;;  %v1638_v46 = vsel %vm1510_vm7, %v1446_v38, %v1574_v42 }
 0x1bf   : > { %v1018_v47 = vpop.f32.mrb[40].mxu0  ;;  %v1146_v48 = vpop.f32.mrb[40].mxu1  ;;  %v2380_v49 = vpack.c.bf16 %v1606_v45, %v1605_v43  ;;  %v2460_v50 = vpack.c.bf16 %v1638_v46, %v1637_v44 }
 0x1c0   : > { %v1415_v51 = vadd.f32 %v3187_v17, %v1018_v47  ;;  %v1447_v52 = vadd.f32 %v3187_v17, %v1146_v48  ;;  %v1020_v53 = vpop.f32.mrb[41].mxu0  ;;  %v1148_v54 = vpop.f32.mrb[41].mxu1 }
 0x1c1   : > { %v1021_v55 = vpop.f32.mrb[42].mxu0  ;;  %v1149_v56 = vpop.f32.mrb[42].mxu1  ;;  %2500 = vst [vmem:[%s3196_s9 + $0x48] sm:$0xff] %v2380_v49   ;;  %2516 = vst [vmem:[%s3196_s9 + $0xc8] sm:$0xff] %v2460_v50  }
 0x1c2   : > { %v1543_v57 = vmul.f32 0.1, %v1415_v51  ;;  %v1575_v58 = vmul.f32 0.1, %v1447_v52  ;;  %v1416_v59 = vadd.f32 %v3187_v17, %v1021_v55  ;;  %v1448_v60 = vadd.f32 %v3187_v17, %v1149_v56  ;;  %v1023_v61 = vpop.f32.mrb[43].mxu0  ;;  %v1151_v62 = vpop.f32.mrb[43].mxu1 }
 0x1c3   : > { %vm1479_vm8 = vcmp.gt.f32.partialorder %v1415_v51, 0.0  ;;  %vm1511_vm9 = vcmp.gt.f32.partialorder %v1447_v52, 0.0 }
 0x1c4   : > { %vm1480_vm10 = vcmp.gt.f32.partialorder %v1416_v59, 0.0  ;;  %v1544_v63 = vmul.f32 0.1, %v1416_v59  ;;  %vm1512_vm11 = vcmp.gt.f32.partialorder %v1448_v60, 0.0  ;;  %v1576_v0 = vmul.f32 0.1, %v1448_v60 }
 0x1c5   : > { %v1607_v1 = vsel %vm1479_vm8, %v1415_v51, %v1543_v57  ;;  %v1639_v2 = vsel %vm1511_vm9, %v1447_v52, %v1575_v58 }
 0x1c6   : > { %v1608_v3 = vsel %vm1480_vm10, %v1416_v59, %v1544_v63  ;;  %v1640_v4 = vsel %vm1512_vm11, %v1448_v60, %v1576_v0 }
 0x1c7   : > { %v1026_v5 = vpop.f32.mrb[44].mxu0  ;;  %v1154_v6 = vpop.f32.mrb[44].mxu1  ;;  %v2385_v7 = vpack.c.bf16 %v1608_v3, %v1607_v1  ;;  %v2465_v8 = vpack.c.bf16 %v1640_v4, %v1639_v2 }
 0x1c8   : > { %v1417_v9 = vadd.f32 %v3187_v17, %v1026_v5  ;;  %v1449_v10 = vadd.f32 %v3187_v17, %v1154_v6  ;;  %v1028_v11 = vpop.f32.mrb[45].mxu0  ;;  %v1156_v12 = vpop.f32.mrb[45].mxu1 }
 0x1c9   : > { %v1029_v13 = vpop.f32.mrb[46].mxu0  ;;  %v1157_v14 = vpop.f32.mrb[46].mxu1  ;;  %2501 = vst [vmem:[%s3196_s9 + $0x50] sm:$0xff] %v2385_v7   ;;  %2517 = vst [vmem:[%s3196_s9 + $0xd0] sm:$0xff] %v2465_v8  }
 0x1ca   : > { %v1545_v15 = vmul.f32 0.1, %v1417_v9  ;;  %v1577_v16 = vmul.f32 0.1, %v1449_v10  ;;  %v1418_v18 = vadd.f32 %v3187_v17, %v1029_v13  ;;  %v1450_v19 = vadd.f32 %v3187_v17, %v1157_v14  ;;  %v1031_v20 = vpop.f32.mrb[47].mxu0  ;;  %v1159_v21 = vpop.f32.mrb[47].mxu1 }
 0x1cb   : > { %vm1481_vm12 = vcmp.gt.f32.partialorder %v1417_v9, 0.0  ;;  %vm1513_vm13 = vcmp.gt.f32.partialorder %v1449_v10, 0.0 }
 0x1cc   : > { %vm1482_vm14 = vcmp.gt.f32.partialorder %v1418_v18, 0.0  ;;  %v1546_v22 = vmul.f32 0.1, %v1418_v18  ;;  %vm1514_vm15 = vcmp.gt.f32.partialorder %v1450_v19, 0.0  ;;  %v1578_v23 = vmul.f32 0.1, %v1450_v19 }
 0x1cd   : > { %v1609_v24 = vsel %vm1481_vm12, %v1417_v9, %v1545_v15  ;;  %v1641_v25 = vsel %vm1513_vm13, %v1449_v10, %v1577_v16 }
 0x1ce   : > { %v1610_v26 = vsel %vm1482_vm14, %v1418_v18, %v1546_v22  ;;  %v1642_v27 = vsel %vm1514_vm15, %v1450_v19, %v1578_v23 }
 0x1cf   : > { %v1034_v28 = vpop.f32.mrb[48].mxu0  ;;  %v1162_v29 = vpop.f32.mrb[48].mxu1  ;;  %v2390_v30 = vpack.c.bf16 %v1610_v26, %v1609_v24  ;;  %v2470_v31 = vpack.c.bf16 %v1642_v27, %v1641_v25 }
 0x1d0   : > { %v1419_v32 = vadd.f32 %v3187_v17, %v1034_v28  ;;  %v1451_v33 = vadd.f32 %v3187_v17, %v1162_v29  ;;  %v1036_v34 = vpop.f32.mrb[49].mxu0  ;;  %v1164_v35 = vpop.f32.mrb[49].mxu1 }
 0x1d1   : > { %v1037_v36 = vpop.f32.mrb[50].mxu0  ;;  %v1165_v37 = vpop.f32.mrb[50].mxu1  ;;  %2502 = vst [vmem:[%s3196_s9 + $0x58] sm:$0xff] %v2390_v30   ;;  %2518 = vst [vmem:[%s3196_s9 + $0xd8] sm:$0xff] %v2470_v31  }
 0x1d2   : > { %v1547_v38 = vmul.f32 0.1, %v1419_v32  ;;  %v1579_v39 = vmul.f32 0.1, %v1451_v33  ;;  %v1420_v40 = vadd.f32 %v3187_v17, %v1037_v36  ;;  %v1452_v41 = vadd.f32 %v3187_v17, %v1165_v37  ;;  %v1039_v42 = vpop.f32.mrb[51].mxu0  ;;  %v1167_v43 = vpop.f32.mrb[51].mxu1 }
 0x1d3   : > { %vm1483_vm0 = vcmp.gt.f32.partialorder %v1419_v32, 0.0  ;;  %vm1515_vm1 = vcmp.gt.f32.partialorder %v1451_v33, 0.0 }
 0x1d4   : > { %vm1484_vm2 = vcmp.gt.f32.partialorder %v1420_v40, 0.0  ;;  %v1548_v44 = vmul.f32 0.1, %v1420_v40  ;;  %vm1516_vm3 = vcmp.gt.f32.partialorder %v1452_v41, 0.0  ;;  %v1580_v45 = vmul.f32 0.1, %v1452_v41 }
 0x1d5   : > { %v1611_v46 = vsel %vm1483_vm0, %v1419_v32, %v1547_v38  ;;  %v1643_v47 = vsel %vm1515_vm1, %v1451_v33, %v1579_v39 }
 0x1d6   : > { %v1612_v48 = vsel %vm1484_vm2, %v1420_v40, %v1548_v44  ;;  %v1644_v49 = vsel %vm1516_vm3, %v1452_v41, %v1580_v45 }
 0x1d7   : > { %v1042_v50 = vpop.f32.mrb[52].mxu0  ;;  %v1170_v51 = vpop.f32.mrb[52].mxu1  ;;  %v2395_v52 = vpack.c.bf16 %v1612_v48, %v1611_v46  ;;  %v2475_v53 = vpack.c.bf16 %v1644_v49, %v1643_v47 }
 0x1d8   : > { %v1421_v54 = vadd.f32 %v3187_v17, %v1042_v50  ;;  %v1453_v55 = vadd.f32 %v3187_v17, %v1170_v51  ;;  %v1044_v56 = vpop.f32.mrb[53].mxu0  ;;  %v1172_v57 = vpop.f32.mrb[53].mxu1 }
 0x1d9   : > { %v1045_v58 = vpop.f32.mrb[54].mxu0  ;;  %v1173_v59 = vpop.f32.mrb[54].mxu1  ;;  %2503 = vst [vmem:[%s3196_s9 + $0x60] sm:$0xff] %v2395_v52   ;;  %2519 = vst [vmem:[%s3196_s9 + $0xe0] sm:$0xff] %v2475_v53  }
 0x1da   : > { %v1549_v60 = vmul.f32 0.1, %v1421_v54  ;;  %v1581_v61 = vmul.f32 0.1, %v1453_v55  ;;  %v1422_v62 = vadd.f32 %v3187_v17, %v1045_v58  ;;  %v1454_v63 = vadd.f32 %v3187_v17, %v1173_v59  ;;  %v1047_v0 = vpop.f32.mrb[55].mxu0  ;;  %v1175_v1 = vpop.f32.mrb[55].mxu1 }
 0x1db   : > { %vm1485_vm4 = vcmp.gt.f32.partialorder %v1421_v54, 0.0  ;;  %vm1517_vm5 = vcmp.gt.f32.partialorder %v1453_v55, 0.0 }
 0x1dc   : > { %vm1486_vm6 = vcmp.gt.f32.partialorder %v1422_v62, 0.0  ;;  %v1550_v2 = vmul.f32 0.1, %v1422_v62  ;;  %vm1518_vm7 = vcmp.gt.f32.partialorder %v1454_v63, 0.0  ;;  %v1582_v3 = vmul.f32 0.1, %v1454_v63 }
 0x1dd   : > { %v1613_v4 = vsel %vm1485_vm4, %v1421_v54, %v1549_v60  ;;  %v1645_v5 = vsel %vm1517_vm5, %v1453_v55, %v1581_v61 }
 0x1de   : > { %v1614_v6 = vsel %vm1486_vm6, %v1422_v62, %v1550_v2  ;;  %v1646_v7 = vsel %vm1518_vm7, %v1454_v63, %v1582_v3 }
 0x1df   : > { %v1050_v8 = vpop.f32.mrb[56].mxu0  ;;  %v1178_v9 = vpop.f32.mrb[56].mxu1  ;;  %v2400_v10 = vpack.c.bf16 %v1614_v6, %v1613_v4  ;;  %v2480_v11 = vpack.c.bf16 %v1646_v7, %v1645_v5 }
 0x1e0   : > { %v1423_v12 = vadd.f32 %v3187_v17, %v1050_v8  ;;  %v1455_v13 = vadd.f32 %v3187_v17, %v1178_v9  ;;  %v1052_v14 = vpop.f32.mrb[57].mxu0  ;;  %v1180_v15 = vpop.f32.mrb[57].mxu1 }
 0x1e1   : > { %v1053_v16 = vpop.f32.mrb[58].mxu0  ;;  %v1181_v18 = vpop.f32.mrb[58].mxu1  ;;  %2504 = vst [vmem:[%s3196_s9 + $0x68] sm:$0xff] %v2400_v10   ;;  %2520 = vst [vmem:[%s3196_s9 + $0xe8] sm:$0xff] %v2480_v11  }
 0x1e2   : > { %v1551_v19 = vmul.f32 0.1, %v1423_v12  ;;  %v1583_v20 = vmul.f32 0.1, %v1455_v13  ;;  %v1424_v21 = vadd.f32 %v3187_v17, %v1053_v16  ;;  %v1456_v22 = vadd.f32 %v3187_v17, %v1181_v18  ;;  %v1055_v23 = vpop.f32.mrb[59].mxu0  ;;  %v1183_v24 = vpop.f32.mrb[59].mxu1 }
 0x1e3   : > { %vm1487_vm8 = vcmp.gt.f32.partialorder %v1423_v12, 0.0  ;;  %vm1519_vm9 = vcmp.gt.f32.partialorder %v1455_v13, 0.0 }
 0x1e4   : > { %vm1488_vm10 = vcmp.gt.f32.partialorder %v1424_v21, 0.0  ;;  %v1552_v25 = vmul.f32 0.1, %v1424_v21  ;;  %vm1520_vm11 = vcmp.gt.f32.partialorder %v1456_v22, 0.0  ;;  %v1584_v26 = vmul.f32 0.1, %v1456_v22 }
 0x1e5   : > { %v1615_v27 = vsel %vm1487_vm8, %v1423_v12, %v1551_v19  ;;  %v1647_v28 = vsel %vm1519_vm9, %v1455_v13, %v1583_v20 }
 0x1e6   : > { %v1616_v29 = vsel %vm1488_vm10, %v1424_v21, %v1552_v25  ;;  %v1648_v30 = vsel %vm1520_vm11, %v1456_v22, %v1584_v26 }
 0x1e7   : > { %v1058_v31 = vpop.f32.mrb[60].mxu0  ;;  %v1186_v32 = vpop.f32.mrb[60].mxu1  ;;  %v2405_v33 = vpack.c.bf16 %v1616_v29, %v1615_v27  ;;  %v2485_v34 = vpack.c.bf16 %v1648_v30, %v1647_v28 }
 0x1e8   : > { %v1425_v35 = vadd.f32 %v3187_v17, %v1058_v31  ;;  %v1457_v36 = vadd.f32 %v3187_v17, %v1186_v32  ;;  %v1060_v37 = vpop.f32.mrb[61].mxu0  ;;  %v1188_v38 = vpop.f32.mrb[61].mxu1 }
 0x1e9   : > { %v1061_v39 = vpop.f32.mrb[62].mxu0  ;;  %v1189_v40 = vpop.f32.mrb[62].mxu1  ;;  %2505 = vst [vmem:[%s3196_s9 + $0x70] sm:$0xff] %v2405_v33   ;;  %2521 = vst [vmem:[%s3196_s9 + $0xf0] sm:$0xff] %v2485_v34  }
 0x1ea   : > { %v1553_v41 = vmul.f32 0.1, %v1425_v35  ;;  %v1585_v42 = vmul.f32 0.1, %v1457_v36  ;;  %v1426_v43 = vadd.f32 %v3187_v17, %v1061_v39  ;;  %v1458_v44 = vadd.f32 %v3187_v17, %v1189_v40  ;;  %v1063_v45 = vpop.f32.mrb[63].mxu0  ;;  %v1191_v46 = vpop.f32.mrb[63].mxu1 }
 0x1eb   : > { %vm1489_vm12 = vcmp.gt.f32.partialorder %v1425_v35, 0.0  ;;  %vm1521_vm13 = vcmp.gt.f32.partialorder %v1457_v36, 0.0 }
 0x1ec   : > { %vm1490_vm14 = vcmp.gt.f32.partialorder %v1426_v43, 0.0  ;;  %v1554_v47 = vmul.f32 0.1, %v1426_v43  ;;  %vm1522_vm15 = vcmp.gt.f32.partialorder %v1458_v44, 0.0  ;;  %v1586_v48 = vmul.f32 0.1, %v1458_v44 }
 0x1ed   : > { %v1617_v49 = vsel %vm1489_vm12, %v1425_v35, %v1553_v41  ;;  %v1649_v17 = vsel %vm1521_vm13, %v1457_v36, %v1585_v42 }
 0x1ee   : > { %v1618_v50 = vsel %vm1490_vm14, %v1426_v43, %v1554_v47  ;;  %v1650_v51 = vsel %vm1522_vm15, %v1458_v44, %v1586_v48 }
 0x1ef   : > { %v2410_v52 = vpack.c.bf16 %v1618_v50, %v1617_v49  ;;  %v2490_v53 = vpack.c.bf16 %v1650_v51, %v1649_v17 }
 0x1f1   : > { %2506 = vst [vmem:[%s3196_s9 + $0x78] sm:$0xff] %v2410_v52   ;;  %2522 = vst [vmem:[%s3196_s9 + $0xf8] sm:$0xff] %v2490_v53  }
 0x1f2   : > { %2818 = shalt.err (!%p2815_p5)
}
 0x1f3   : > { %s2819_s29 = scalar_lea.hbm %s3291_s26, 4096  ;;  %s2823_s20 = scalar_lea.hbm %s3346_s3, 16384 }
 0x1f4   : > { %p2820_p9 = scmp.ne.s32.totalorder %s3291_s26, %s2819_s29  ;;  %p2824_p3 = scmp.lt.u32.totalorder %s3291_s26, %s3346_s3 }
 0x1f5   : > { %p2825_p7 = scmp.lt.u32.totalorder %s2823_s20, %s2819_s29  ;;  %p2827_p4 = scmp.lt.u32.totalorder %s2819_s29, %s3291_s26 }
 0x1f6   : > { %p2821_p1 = pnand %p2820_p9, %p3018_p11 }
 0x1f7   : > { %p2826_p13 = por %p2825_p7, %p2824_p3 }
 0x1f8   : > { %p2822_p2 = pneg %p2821_p1 }
 0x1f9   : > { %p2828_p6 = por %p2827_p4, %p2826_p13 }
 0x1fb   : > { %p2829_p8 = pnand %p2828_p6, %p2822_p2 }
 0x1fd   : > { %2832 = shalt.err (!%p2829_p8)
}
 0x1fe   : > { %s2901_s9 = smov 64   ;;  %s2902_s10 = smov 4  }
 0x1ff   : > { %2561 = dma.vmem_to_hbm [thread:$0]  (%p3018_p11), %s3293_s11, 4096, %s3291_s26, %s1972_s7, %s2901_s9, %s2901_s9, %s2902_s10  }
 0x200 PF: > { %p2578_p12 = scmp.ge.s32.totalorder %s2891_s17, 2  ;;  %s2001_s15 = sand.u32 1, %s2871_s12  }
 0x201   : > { %p3364_p10 = scmp.ne.s32.totalorder %s3354_s23, 0  ;;  %s2002_s18 = scalar_lea.sflag [#allocation5], %s2001_s15 }
 0x203   : > { %p2572_p0 = pnand %p2578_p12, %p3364_p10 }
 0x205   : > { %2866 = dma.done.wait (!%p2572_p0), %s2002_s18, 4096  }
 0x206   : > { %2868 = vsyncadd (!%p2572_p0), %s2002_s18, 4294963200  ;;  %s20_s17 = sadd.s32 1, %s2891_s17   ;;  %s3365_s12 = smov %s2875_s13 }
 0x207   : > { %p17_p5 = scmp.ge.s32.totalorder %s20_s17, 6   ;;  %s3366_s13 = smov %s2879_s14 }
 0x208   : > { %s3367_s14 = smov %s3027_s5  ;;  %s3368_s15 = smov %s2887_s16 }
 0x209   : > { %s3369_s16 = smov %s3371_s28  ;;  %19 = sbr.rel (!%p17_p5) target bundleno = 7 (0x7), region = 93 }
 0x210   :  { %2007 = vsyncpa [#allocation4], 1 }
 0x211   :  { %2009 = vsyncpa [#allocation4 + $0x1], 1 }
 0x212   :  { %2010 = vsyncpa [#allocation7], 1 }
 0x213   :  { %2011 = vsyncpa [#allocation5], 1 }
 0x214   :  { %2013 = vsyncpa [#allocation5 + $0x1], 1 }

</bundles_post_ra>
